<compile_context>
chip_gen: v5e
topology: v5e:2x2
jax: 0.10.0
libtpu: 0.0.40
codegen_flags: <defaults>
</compile_context>

<pallas_src>
import functools

import jax
import jax.numpy as jnp
from jax import lax
from jax.experimental import pallas as pl
from jax.experimental.pallas import tpu as pltpu


def _keep_mask(seed_u32, layer_salt_u32, row0_u32, shape):
    """Exact p=0.5 keep-mask from a counter-based hash (no HW PRNG needed)."""
    r = lax.broadcasted_iota(jnp.uint32, shape, 0) + row0_u32
    c = lax.broadcasted_iota(jnp.uint32, shape, 1)
    x = (r * jnp.uint32(0x85EBCA6B)
         + c * jnp.uint32(0xC2B2AE35)
         + seed_u32
         + layer_salt_u32 * jnp.uint32(0x9E3779B9))
    # splitmix32-style avalanche finalizer
    x = x ^ (x >> 16)
    x = x * jnp.uint32(0x7FEB352D)
    x = x ^ (x >> 15)
    x = x * jnp.uint32(0x846CA68B)
    x = x ^ (x >> 16)
    return x < jnp.uint32(0x80000000)      # keep with prob exactly 1/2


def _prenet_fused_kernel(num_layers, tm, seed_ref, x_ref, *refs):
    """Fused Prenet: refs = (w1^T, b1, w2^T, b2, ..., out)."""
    o_ref = refs[-1]
    wb = refs[:-1]
    seed = seed_ref[0].astype(jnp.uint32)
    row0 = (pl.program_id(0) * tm).astype(jnp.uint32)   # global row offset of tile

    h = x_ref[...]
    for li in range(num_layers):
        w_ref = wb[2 * li]
        b_ref = wb[2 * li + 1]
        # MXU matmul: bf16 inputs, f32 accumulation.
        y = jnp.dot(h.astype(w_ref.dtype), w_ref[...],
                    preferred_element_type=jnp.float32)
        y = jnp.maximum(y + b_ref[...], 0.0)             # bias + ReLU (VPU)
        keep = _keep_mask(seed, jnp.uint32(li + 1), row0, y.shape)
        h = jnp.where(keep, y * 2.0, 0.0)                # dropout(p=0.5), scaled
    o_ref[...] = h.astype(o_ref.dtype)


def _round_up(x, m):
    return (x + m - 1) // m * m


def prenet_forward(x, params, base_seed=0, row_tile=512):
    """Applies the full Prenet stack.

    x: (..., in_features) float.  Returns (..., out_features[-1]) float32.
    params: list of (w_t, b) with w_t (in, out), b (1, out), float32.
    """
    lead_shape = x.shape[:-1]
    h = x.reshape(-1, x.shape[-1])
    n, d_in = h.shape
    d_last = params[-1][0].shape[1]

    # Row tile: single tile for small inputs, capped at row_tile for large N.
    tm = min(row_tile, _round_up(max(n, 8), 8))
    n_pad = _round_up(n, tm)
    if n_pad != n:
        h = jnp.pad(h, ((0, n_pad - n), (0, 0)))

    # bf16 matmul inputs (f32 accumulate): full-rate MXU on v6e/v7x, half DMA.
    h = h.astype(jnp.bfloat16)

    flat_args = []
    in_specs = [
        pl.BlockSpec(memory_space=pltpu.MemorySpace.SMEM),          # seed scalar
        pl.BlockSpec((tm, d_in), lambda i: (i, 0)),                 # row tile of x
    ]
    for (w_t, b) in params:
        di, do = w_t.shape
        flat_args.append(w_t.astype(jnp.bfloat16))                  # resident W^T
        flat_args.append(b.reshape(1, do).astype(jnp.float32))      # resident bias
        in_specs.append(pl.BlockSpec((di, do), lambda i: (0, 0)))
        in_specs.append(pl.BlockSpec((1, do), lambda i: (0, 0)))

    seed = jnp.asarray([base_seed], dtype=jnp.int32)
    kernel = functools.partial(_prenet_fused_kernel, len(params), tm)

    out = pl.pallas_call(
        kernel,
        grid=(n_pad // tm,),
        out_shape=jax.ShapeDtypeStruct((n_pad, d_last), jnp.float32),
        in_specs=in_specs,
        out_specs=pl.BlockSpec((tm, d_last), lambda i: (i, 0)),
        compiler_params=pltpu.CompilerParams(
            dimension_semantics=("parallel",),                      # megacore on v7x
        ),
    )(seed, h, *flat_args)

    return out[:n].reshape(*lead_shape, d_last)


def init_prenet_params(key, in_features, out_features=(256, 128)):
    """Deterministic xavier-uniform (relu gain) init, matching init_layers()."""
    sizes_in = [in_features] + list(out_features[:-1])
    params = []
    gain = jnp.sqrt(2.0)  # calculate_gain('relu')
    for d_in, d_out in zip(sizes_in, out_features):
        key, wk = jax.random.split(key)
        limit = gain * jnp.sqrt(6.0 / (d_in + d_out))
        w_t = jax.random.uniform(wk, (d_in, d_out), jnp.float32, -limit, limit)
        b = jnp.zeros((1, d_out), jnp.float32)
        params.append((w_t, b))
    return params


if __name__ == "__main__":
    key = jax.random.PRNGKey(0)
    batch, seq, in_features = 2, 8, 32
    out_features = (256, 128)

    pkey, xkey = jax.random.split(key)
    params = init_prenet_params(pkey, in_features, out_features)
    x = jax.random.normal(xkey, (batch, seq, in_features), jnp.float32)

    out = prenet_forward(x, params, base_seed=1234)
    out = jax.block_until_ready(out)

    assert out.shape == (batch, seq, out_features[-1]), out.shape
    assert out.dtype == jnp.float32
    assert bool(jnp.all(out >= 0.0))          # post-ReLU/dropout values are >= 0
    assert bool(jnp.all(jnp.isfinite(out)))
    print("KERNEL_OK")
</pallas_src>

<mosaic_0001>
module attributes {stable_mosaic.version = 11 : i64} {
  func.func @_prenet_fused_kernel(%arg0: i32, %arg1: memref<1xi32, #tpu.memory_space<smem>>, %arg2: memref<16x32xbf16, #tpu.memory_space<vmem>>, %arg3: memref<32x256xbf16, #tpu.memory_space<vmem>>, %arg4: memref<1x256xf32, #tpu.memory_space<vmem>>, %arg5: memref<256x128xbf16, #tpu.memory_space<vmem>>, %arg6: memref<1x128xf32, #tpu.memory_space<vmem>>, %arg7: memref<16x128xf32, #tpu.memory_space<vmem>>) attributes {dimension_semantics = [#tpu.dimension_semantics<parallel>], iteration_bounds = array<i64: 1>, scalar_prefetch = 0 : i64, scratch_operands = 0 : i64, tpu.core_type = #tpu.core_type<tc>, window_params = [{transform_indices = @transform_0, window_bounds = array<i64: 1>}, {transform_indices = @transform_1, window_bounds = array<i64: 16, 32>}, {pipeline_mode = #tpu.pipeline_mode<synchronous>, transform_indices = @transform_2, window_bounds = array<i64: 32, 256>}, {pipeline_mode = #tpu.pipeline_mode<synchronous>, transform_indices = @transform_3, window_bounds = array<i64: 1, 256>}, {pipeline_mode = #tpu.pipeline_mode<synchronous>, transform_indices = @transform_4, window_bounds = array<i64: 256, 128>}, {pipeline_mode = #tpu.pipeline_mode<synchronous>, transform_indices = @transform_5, window_bounds = array<i64: 1, 128>}, {transform_indices = @transform_6, window_bounds = array<i64: 16, 128>}]} {
    %c0 = arith.constant 0 : index
    %0 = memref.load %arg1[%c0] : memref<1xi32, #tpu.memory_space<smem>>
    %c16_i32 = arith.constant 16 : i32
    %1 = arith.muli %arg0, %c16_i32 : i32
    %c0_0 = arith.constant 0 : index
    %c0_1 = arith.constant 0 : index
    %2 = vector.load %arg2[%c0_0, %c0_1] : memref<16x32xbf16, #tpu.memory_space<vmem>>, vector<16x32xbf16>
    %c0_2 = arith.constant 0 : index
    %c0_3 = arith.constant 0 : index
    %3 = vector.load %arg3[%c0_2, %c0_3] : memref<32x256xbf16, #tpu.memory_space<vmem>>, vector<32x256xbf16>
    %cst = arith.constant dense<0.000000e+00> : vector<16x256xf32>
    %4 = tpu.matmul %2, %3, %cst {dimension_numbers = #tpu.dot_dimension_numbers<[1], [0], [0], [1], [0, 0, 1, 1], [], []>} : vector<16x32xbf16>, vector<32x256xbf16>, vector<16x256xf32> -> vector<16x256xf32>
    %c0_4 = arith.constant 0 : index
    %c0_5 = arith.constant 0 : index
    %5 = vector.load %arg4[%c0_4, %c0_5] : memref<1x256xf32, #tpu.memory_space<vmem>>, vector<1x256xf32>
    %6 = vector.broadcast %5 : vector<1x256xf32> to vector<16x256xf32>
    %7 = arith.addf %4, %6 : vector<16x256xf32>
    %cst_6 = arith.constant 0.000000e+00 : f32
    %8 = vector.broadcast %cst_6 : f32 to vector<16x256xf32>
    %9 = arith.maximumf %7, %8 : vector<16x256xf32>
    %10 = tpu.iota {dimensions = array<i32: 0>} : vector<16x256xi32>
    %11 = vector.broadcast %1 : i32 to vector<16x256xi32>
    %12 = arith.addi %10, %11 : vector<16x256xi32>
    %13 = tpu.iota {dimensions = array<i32: 1>} : vector<16x256xi32>
    %c-2048144789_i32 = arith.constant -2048144789 : i32
    %14 = vector.broadcast %c-2048144789_i32 : i32 to vector<16x256xi32>
    %15 = arith.muli %12, %14 : vector<16x256xi32>
    %c-1028477387_i32 = arith.constant -1028477387 : i32
    %16 = vector.broadcast %c-1028477387_i32 : i32 to vector<16x256xi32>
    %17 = arith.muli %13, %16 : vector<16x256xi32>
    %18 = arith.addi %15, %17 : vector<16x256xi32>
    %19 = vector.broadcast %0 : i32 to vector<16x256xi32>
    %20 = arith.addi %18, %19 : vector<16x256xi32>
    %c1_i32 = arith.constant 1 : i32
    %c-1640531527_i32 = arith.constant -1640531527 : i32
    %21 = arith.muli %c1_i32, %c-1640531527_i32 : i32
    %22 = vector.broadcast %21 : i32 to vector<16x256xi32>
    %23 = arith.addi %20, %22 : vector<16x256xi32>
    %c16_i32_7 = arith.constant 16 : i32
    %24 = vector.broadcast %c16_i32_7 : i32 to vector<16x256xi32>
    %25 = arith.shrui %23, %24 : vector<16x256xi32>
    %26 = arith.xori %23, %25 : vector<16x256xi32>
    %c2146121005_i32 = arith.constant 2146121005 : i32
    %27 = vector.broadcast %c2146121005_i32 : i32 to vector<16x256xi32>
    %28 = arith.muli %26, %27 : vector<16x256xi32>
    %c15_i32 = arith.constant 15 : i32
    %29 = vector.broadcast %c15_i32 : i32 to vector<16x256xi32>
    %30 = arith.shrui %28, %29 : vector<16x256xi32>
    %31 = arith.xori %28, %30 : vector<16x256xi32>
    %c-2073254261_i32 = arith.constant -2073254261 : i32
    %32 = vector.broadcast %c-2073254261_i32 : i32 to vector<16x256xi32>
    %33 = arith.muli %31, %32 : vector<16x256xi32>
    %c16_i32_8 = arith.constant 16 : i32
    %34 = vector.broadcast %c16_i32_8 : i32 to vector<16x256xi32>
    %35 = arith.shrui %33, %34 : vector<16x256xi32>
    %36 = arith.xori %33, %35 : vector<16x256xi32>
    %c-2147483648_i32 = arith.constant -2147483648 : i32
    %37 = vector.broadcast %c-2147483648_i32 : i32 to vector<16x256xi32>
    %38 = arith.cmpi ult, %36, %37 : vector<16x256xi32>
    %cst_9 = arith.constant 2.000000e+00 : f32
    %39 = vector.broadcast %cst_9 : f32 to vector<16x256xf32>
    %40 = arith.mulf %9, %39 : vector<16x256xf32>
    %cst_10 = arith.constant 0.000000e+00 : f32
    %41 = vector.broadcast %cst_10 : f32 to vector<16x256xf32>
    %42 = arith.select %38, %40, %41 : vector<16x256xi1>, vector<16x256xf32>
    %43 = arith.truncf %42 : vector<16x256xf32> to vector<16x256xbf16>
    %c0_11 = arith.constant 0 : index
    %c0_12 = arith.constant 0 : index
    %44 = vector.load %arg5[%c0_11, %c0_12] : memref<256x128xbf16, #tpu.memory_space<vmem>>, vector<256x128xbf16>
    %cst_13 = arith.constant dense<0.000000e+00> : vector<16x128xf32>
    %45 = tpu.matmul %43, %44, %cst_13 {dimension_numbers = #tpu.dot_dimension_numbers<[1], [0], [0], [1], [0, 0, 1, 1], [], []>} : vector<16x256xbf16>, vector<256x128xbf16>, vector<16x128xf32> -> vector<16x128xf32>
    %c0_14 = arith.constant 0 : index
    %c0_15 = arith.constant 0 : index
    %46 = vector.load %arg6[%c0_14, %c0_15] : memref<1x128xf32, #tpu.memory_space<vmem>>, vector<1x128xf32>
    %47 = vector.broadcast %46 : vector<1x128xf32> to vector<16x128xf32>
    %48 = arith.addf %45, %47 : vector<16x128xf32>
    %cst_16 = arith.constant 0.000000e+00 : f32
    %49 = vector.broadcast %cst_16 : f32 to vector<16x128xf32>
    %50 = arith.maximumf %48, %49 : vector<16x128xf32>
    %51 = tpu.iota {dimensions = array<i32: 0>} : vector<16x128xi32>
    %52 = vector.broadcast %1 : i32 to vector<16x128xi32>
    %53 = arith.addi %51, %52 : vector<16x128xi32>
    %54 = tpu.iota {dimensions = array<i32: 1>} : vector<16x128xi32>
    %c-2048144789_i32_17 = arith.constant -2048144789 : i32
    %55 = vector.broadcast %c-2048144789_i32_17 : i32 to vector<16x128xi32>
    %56 = arith.muli %53, %55 : vector<16x128xi32>
    %c-1028477387_i32_18 = arith.constant -1028477387 : i32
    %57 = vector.broadcast %c-1028477387_i32_18 : i32 to vector<16x128xi32>
    %58 = arith.muli %54, %57 : vector<16x128xi32>
    %59 = arith.addi %56, %58 : vector<16x128xi32>
    %60 = vector.broadcast %0 : i32 to vector<16x128xi32>
    %61 = arith.addi %59, %60 : vector<16x128xi32>
    %c2_i32 = arith.constant 2 : i32
    %c-1640531527_i32_19 = arith.constant -1640531527 : i32
    %62 = arith.muli %c2_i32, %c-1640531527_i32_19 : i32
    %63 = vector.broadcast %62 : i32 to vector<16x128xi32>
    %64 = arith.addi %61, %63 : vector<16x128xi32>
    %c16_i32_20 = arith.constant 16 : i32
    %65 = vector.broadcast %c16_i32_20 : i32 to vector<16x128xi32>
    %66 = arith.shrui %64, %65 : vector<16x128xi32>
    %67 = arith.xori %64, %66 : vector<16x128xi32>
    %c2146121005_i32_21 = arith.constant 2146121005 : i32
    %68 = vector.broadcast %c2146121005_i32_21 : i32 to vector<16x128xi32>
    %69 = arith.muli %67, %68 : vector<16x128xi32>
    %c15_i32_22 = arith.constant 15 : i32
    %70 = vector.broadcast %c15_i32_22 : i32 to vector<16x128xi32>
    %71 = arith.shrui %69, %70 : vector<16x128xi32>
    %72 = arith.xori %69, %71 : vector<16x128xi32>
    %c-2073254261_i32_23 = arith.constant -2073254261 : i32
    %73 = vector.broadcast %c-2073254261_i32_23 : i32 to vector<16x128xi32>
    %74 = arith.muli %72, %73 : vector<16x128xi32>
    %c16_i32_24 = arith.constant 16 : i32
    %75 = vector.broadcast %c16_i32_24 : i32 to vector<16x128xi32>
    %76 = arith.shrui %74, %75 : vector<16x128xi32>
    %77 = arith.xori %74, %76 : vector<16x128xi32>
    %c-2147483648_i32_25 = arith.constant -2147483648 : i32
    %78 = vector.broadcast %c-2147483648_i32_25 : i32 to vector<16x128xi32>
    %79 = arith.cmpi ult, %77, %78 : vector<16x128xi32>
    %cst_26 = arith.constant 2.000000e+00 : f32
    %80 = vector.broadcast %cst_26 : f32 to vector<16x128xf32>
    %81 = arith.mulf %50, %80 : vector<16x128xf32>
    %cst_27 = arith.constant 0.000000e+00 : f32
    %82 = vector.broadcast %cst_27 : f32 to vector<16x128xf32>
    %83 = arith.select %79, %81, %82 : vector<16x128xi1>, vector<16x128xf32>
    %c0_28 = arith.constant 0 : index
    %c0_29 = arith.constant 0 : index
    %84 = vector.load %arg7[%c0_28, %c0_29] : memref<16x128xf32, #tpu.memory_space<vmem>>, vector<16x128xf32>
    tpu.vector_store %arg7[%c0_28, %c0_29], %83 {strides = array<i32>} : memref<16x128xf32, #tpu.memory_space<vmem>>, vector<16x128xf32>,
    return
  }
  func.func @transform_0(%arg0: i32) -> i32 {
    %c0_i32 = arith.constant 0 : i32
    %c0_i32_0 = arith.constant 0 : i32
    return %c0_i32 : i32
  }
  func.func @transform_1(%arg0: i32) -> (i32, i32) {
    %c0_i32 = arith.constant 0 : i32
    %c0_i32_0 = arith.constant 0 : i32
    return %arg0, %c0_i32 : i32, i32
  }
  func.func @transform_2(%arg0: i32) -> (i32, i32) {
    %c0_i32 = arith.constant 0 : i32
    %c0_i32_0 = arith.constant 0 : i32
    %c0_i32_1 = arith.constant 0 : i32
    return %c0_i32, %c0_i32_0 : i32, i32
  }
  func.func @transform_3(%arg0: i32) -> (i32, i32) {
    %c0_i32 = arith.constant 0 : i32
    %c0_i32_0 = arith.constant 0 : i32
    %c0_i32_1 = arith.constant 0 : i32
    return %c0_i32, %c0_i32_0 : i32, i32
  }
  func.func @transform_4(%arg0: i32) -> (i32, i32) {
    %c0_i32 = arith.constant 0 : i32
    %c0_i32_0 = arith.constant 0 : i32
    %c0_i32_1 = arith.constant 0 : i32
    return %c0_i32, %c0_i32_0 : i32, i32
  }
  func.func @transform_5(%arg0: i32) -> (i32, i32) {
    %c0_i32 = arith.constant 0 : i32
    %c0_i32_0 = arith.constant 0 : i32
    %c0_i32_1 = arith.constant 0 : i32
    return %c0_i32, %c0_i32_0 : i32, i32
  }
  func.func @transform_6(%arg0: i32) -> (i32, i32) {
    %c0_i32 = arith.constant 0 : i32
    %c0_i32_0 = arith.constant 0 : i32
    return %arg0, %c0_i32 : i32, i32
  }
}

</mosaic_0001>

<bundles_post_ra>
// kernel: tpu_custom_call.1
= control target key start
LH: loop header
LB: loop body
LE: loop exit
PB: predicated region body
PF: predicated region fallthrough
CT: control target
= control target key end

     0   :  { %12 = vsyncpa [#allocation4], 0  ;;  %s748_s0 = inlined_call_operand.<no memory space> [shape: s32[1], index: 0, kind: input, shape index: {}]   ;;  %s749_s1 = inlined_call_operand.hbm [shape: bf16[16,32], index: 1, kind: input, shape index: {}]   ;;  %s750_s2 = inlined_call_operand.hbm [shape: bf16[32,256], index: 2, kind: input, shape index: {}]   ;;  %s751_s3 = inlined_call_operand.vmem [shape: f32[1,256], index: 3, kind: input, shape index: {}]   ;;  %s752_s4 = inlined_call_operand.hbm [shape: bf16[256,128], index: 4, kind: input, shape index: {}]   ;;  %s753_s5 = inlined_call_operand.vmem [shape: f32[1,128], index: 5, kind: input, shape index: {}]   ;;  %s754_s6 = inlined_call_operand.hbm [shape: f32[16,128], index: 6, kind: output, shape index: {}]  }
   0x1   :  { %13 = vsyncpa [#allocation7], 0  ;;  %s34_s23 = sshll.u32 %s750_s2, 4  ;;  %s35_s23 = int_to_ptr.hbm [resolvable:$true] %s34_s23 }
   0x2   :  { %14 = vsyncpa [#allocation5], 0  ;;  %s670_s24 = smov [#allocation6]   ;;  %s21_s28 = sshll.u32 %s749_s1, 4  ;;  %s22_s28 = int_to_ptr.hbm [resolvable:$true] %s21_s28 }
   0x3   :  { %s36_s25 = sshll.u32 %s670_s24, 4  ;;  %s671_s29 = smov 128   ;;  %s37_s25 = int_to_ptr.vmem [resolvable:$true] %s36_s25 }
   0x4   :  { %s672_s30 = smov 8   ;;  %s673_s7 = smov [#allocation3]  }
   0x5   :  { %42 = dma.hbm_to_vmem [thread:$0]  %s35_s23, 512, %s37_s25, [#allocation7], %s671_s29, %s671_s29, %s672_s30  }
   0x6   :  { %s23_s8 = sshll.u32 %s673_s7, 4  ;;  %s674_s2 = smov 64   ;;  %s24_s8 = int_to_ptr.vmem [resolvable:$true] %s23_s8 }
   0x7   :  { %s675_s9 = smov 4   ;;  %s49_s12 = sshll.u32 %s752_s4, 4  ;;  %s50_s12 = int_to_ptr.hbm [resolvable:$true] %s49_s12 }
   0x8   :  { %29 = dma.hbm_to_vmem [thread:$0]  %s22_s28, 128, %s24_s8, [#allocation4], %s674_s2, %s674_s2, %s675_s9  }
   0x9   :  { %s676_s13 = smov [#allocation8]  }
   0xa   :  { %s51_s1 = sshll.u32 %s676_s13, 4  ;;  %s52_s1 = int_to_ptr.vmem [resolvable:$true] %s51_s1 }
   0xb   :  { %57 = dma.hbm_to_vmem [thread:$0]  %s50_s12, 2048, %s52_s1, [#allocation7], %s674_s2, %s674_s2, %s675_s9  }
   0xc   :  { %664 = dma.done.wait [#allocation4], 128  }
   0xd   :  { %665 = vsyncadd [#allocation4], 4294967168 }
   0xe   :  { %666 = dma.done.wait [#allocation7], 2560  }
   0xf   :  { %667 = vsyncadd [#allocation7], 4294964736  ;;  %v454_v0 = vld [vmem:[#allocation6 + $0x10] sm:$0xf]  ;;  %v542_v1 = vld [vmem:[#allocation6 + $0x14] sm:$0xf0]  ;;  %v148_v21 = vlaneseq  ;;  %v165_v32 = vstv %s748_s0 }
  0x10   :  { %v541_v2 = vld [vmem:[#allocation6 + $0x14] sm:$0xf]  ;;  %v455_v3 = vor.u32 %v542_v1, %v454_v0  ;;  %v456_v4 = vld [vmem:[#allocation6 + $0x18] sm:$0xf0]  ;;  %v446_v5 = vld [vmem:[#allocation6] sm:$0xf] }
  0x11   :  { %v540_v6 = vld [vmem:[#allocation6 + $0x4] sm:$0xf0]  ;;  %v459_v7 = vor.u32 %v541_v2, %v456_v4  ;;  %v539_v8 = vld [vmem:[#allocation6 + $0x4] sm:$0xf]  ;;  %v448_v9 = vld [vmem:[#allocation6 + $0x8] sm:$0xf0] }
  0x12   :  { %122 = vmatpush.bf16.msra.mxu0 %v455_v3  ;;  %v447_v10 = vor.u32 %v540_v6, %v446_v5  ;;  %v550_v11 = vld [vmem:[#allocation8 + $0x38] sm:$0xff]  ;;  %v451_v13 = vor.u32 %v539_v8, %v448_v9  ;;  %v549_v14 = vld [vmem:[#allocation8 + $0x30] sm:$0xff]  ;;  %vm112_vm0 = vcmask 261120   ;;  %v548_v17 = vld [vmem:[#allocation8 + $0x28] sm:$0xff]  ;;  %v149_v22 = vshrl.u32 %v148_v21, 7  ;;  %s426_s20 = sshll.u32 %s754_s6, 4  ;;  %s427_s20 = int_to_ptr.hbm [resolvable:$true] %s426_s20 }
  0x13   :  { %v558_v12 = vld [vmem:[#allocation8 + $0x78] sm:$0xff]  ;;  %136 = vmatpush.bf16.msra.mxu1 %v459_v7  ;;  %360 = vmatpush.bf16.msra.mxu2 %v550_v11  ;;  %v557_v15 = vld [vmem:[#allocation8 + $0x70] sm:$0xff]  ;;  %v556_v18 = vld [vmem:[#allocation8 + $0x68] sm:$0xff]  ;;  %v155_v23 = vand.u32 127, %v148_v21 }
  0x14   :  { %374 = vmatpush.bf16.msra.mxu3 %v558_v12  ;;  %v538_v16 = vld [vmem:[#allocation3] sm:$0xff]  ;;  %v547_v19 = vld [vmem:[#allocation8 + $0x20] sm:$0xff]  ;;  %v150_v24 = vadd.s32 8, %v149_v22  ;;  %v157_v26 = vmul.u32 2246822507, %v149_v22  ;;  %v545_v45 = vld [vmem:[#allocation8 + $0x10] sm:$0xff] }
  0x15   :  { %v555_v20 = vld [vmem:[#allocation8 + $0x60] sm:$0xff]  ;;  %v156_v25 = vadd.s32 128, %v155_v23  ;;  %v159_v28 = vmul.u32 3266489909, %v155_v23  ;;  %v546_v39 = vld [vmem:[#allocation8 + $0x18] sm:$0xff]  ;;  %v553_v46 = vld [vmem:[#allocation8 + $0x50] sm:$0xff] }
  0x16   :  { %123 = vmatpush.bf16.msra.mxu0 %v447_v10  ;;  %v158_v27 = vmul.u32 2246822507, %v150_v24  ;;  %v554_v40 = vld [vmem:[#allocation8 + $0x58] sm:$0xff]  ;;  %v544_v51 = vld [vmem:[#allocation8 + $0x8] sm:$0xff]  ;;  %v543_v57 = vld [vmem:[#allocation8] sm:$0xff] }
  0x17   :  { %137 = vmatpush.bf16.msra.mxu1 %v451_v13  ;;  %361 = vmatpush.bf16.msra.mxu2 %v549_v14  ;;  %v160_v29 = vmul.u32 3266489909, %v156_v25  ;;  %v161_v30 = vadd.s32 %v159_v28, %v157_v26  ;;  %v552_v52 = vld [vmem:[#allocation8 + $0x48] sm:$0xff]  ;;  %v551_v58 = vld [vmem:[#allocation8 + $0x40] sm:$0xff]  ;;  %v81_v11 = vld [vmem:[%s751_s3] sm:$0x3] }
  0x18   :  { %375 = vmatpush.bf16.msra.mxu3 %v557_v15  ;;  %v163_v31 = vadd.s32 %v159_v28, %v158_v27 }
  0x19   :  { %460 = vmatmul.msk.bf16.vlgmr.msra.gmra.mxu0 %vm112_vm0, %v538_v16  ;;  %v162_v33 = vadd.s32 %v160_v29, %v157_v26  ;;  %v164_v34 = vadd.s32 %v160_v29, %v158_v27  ;;  %v728_v35 = vadd.s32 %v165_v32, %v161_v30 }
  0x1a   :  { %461 = vmatmul.msk.bf16.vlgmr.msra.gmra.mxu1 %vm112_vm0, %v538_v16  ;;  %v730_v36 = vadd.s32 %v165_v32, %v163_v31 }
  0x1b   :  { %362 = vmatpush.bf16.msra.mxu2 %v548_v17  ;;  %v167_v37 = vadd.s32 %v165_v32, %v162_v33  ;;  %v169_v38 = vadd.s32 %v165_v32, %v164_v34  ;;  %v170_v41 = vadd.s32 2654435769, %v728_v35  ;;  %v83_v17 = vperm.slane %v81_v11, 0 }
  0x1c   :  { %376 = vmatpush.bf16.msra.mxu3 %v556_v18  ;;  %v172_v42 = vadd.s32 2654435769, %v730_v36 }
  0x1d   :  { %v171_v43 = vadd.s32 2654435769, %v167_v37  ;;  %v173_v44 = vadd.s32 2654435769, %v169_v38  ;;  %v174_v47 = vshrl.u32 %v170_v41, 16 }
  0x1e   :  { %v176_v48 = vshrl.u32 %v172_v42, 16 }
  0x1f   :  { %363 = vmatpush.bf16.msra.mxu2 %v547_v19  ;;  %v175_v49 = vshrl.u32 %v171_v43, 16  ;;  %v177_v50 = vshrl.u32 %v173_v44, 16  ;;  %v178_v53 = vxor.u32 %v174_v47, %v170_v41  ;;  %v84_v19 = vperm.slane %v81_v11, 1 }
  0x20   :  { %377 = vmatpush.bf16.msra.mxu3 %v555_v20  ;;  %v180_v54 = vxor.u32 %v176_v48, %v172_v42 }
  0x21   :  { %v179_v55 = vxor.u32 %v175_v49, %v171_v43  ;;  %v181_v56 = vxor.u32 %v177_v50, %v173_v44  ;;  %v182_v59 = vmul.u32 2146121005, %v178_v53  ;;  %v391_v49 = vadd.s32 1013904242, %v730_v36 }
  0x22   :  { %v184_v60 = vmul.u32 2146121005, %v180_v54 }
  0x23   :  { %364 = vmatpush.bf16.msra.mxu2 %v546_v39  ;;  %v183_v61 = vmul.u32 2146121005, %v179_v55  ;;  %v185_v62 = vmul.u32 2146121005, %v181_v56  ;;  %v186_v63 = vshrl.u32 %v182_v59, 15 }
  0x24   :  { %378 = vmatpush.bf16.msra.mxu3 %v554_v40  ;;  %v188_v0 = vshrl.u32 %v184_v60, 15 }
  0x25   :  { %v187_v1 = vshrl.u32 %v183_v61, 15  ;;  %v189_v2 = vshrl.u32 %v185_v62, 15  ;;  %v190_v3 = vxor.u32 %v186_v63, %v182_v59 }
  0x26   :  { %v192_v4 = vxor.u32 %v188_v0, %v184_v60  ;;  %v567_v60 = vld [vmem:[%s753_s5] ss:$0 sm:$0xff]  ;;  %s677_s5 = smov [#allocation9]  }
  0x27   :  { %365 = vmatpush.bf16.msra.mxu2 %v545_v45  ;;  %v191_v5 = vxor.u32 %v187_v1, %v183_v61  ;;  %v193_v6 = vxor.u32 %v189_v2, %v185_v62  ;;  %v194_v7 = vmul.u32 2221713035, %v190_v3  ;;  %s424_s17 = sshll.u32 %s677_s5, 4  ;;  %s425_s17 = int_to_ptr.vmem [resolvable:$true] %s424_s17 }
  0x28   :  { %379 = vmatpush.bf16.msra.mxu3 %v553_v46  ;;  %v196_v8 = vmul.u32 2221713035, %v192_v4  ;;  %v390_v46 = vadd.s32 1013904242, %v728_v35 }
  0x29   :  { %v195_v9 = vmul.u32 2221713035, %v191_v5  ;;  %v197_v10 = vmul.u32 2221713035, %v193_v6  ;;  %v198_v12 = vshrl.u32 %v194_v7, 16 }
  0x2a   :  { %v200_v13 = vshrl.u32 %v196_v8, 16  ;;  %v392_v47 = vshrl.u32 %v390_v46, 16 }
  0x2b   :  { %366 = vmatpush.bf16.msra.mxu2 %v544_v51  ;;  %v199_v15 = vshrl.u32 %v195_v9, 16  ;;  %v201_v16 = vshrl.u32 %v197_v10, 16  ;;  %v202_v20 = vxor.u32 %v198_v12, %v194_v7  ;;  %v393_v51 = vshrl.u32 %v391_v49, 16 }
  0x2c   :  { %380 = vmatpush.bf16.msra.mxu3 %v552_v52  ;;  %v204_v21 = vxor.u32 %v200_v13, %v196_v8  ;;  %v394_v48 = vxor.u32 %v392_v47, %v390_v46 }
  0x2d   :  { %v203_v22 = vxor.u32 %v199_v15, %v195_v9  ;;  %v205_v23 = vxor.u32 %v201_v16, %v197_v10  ;;  %v462_v26 = vxor.u32 2147483648, %v202_v20  ;;  %v395_v53 = vxor.u32 %v393_v51, %v391_v49 }
  0x2e   :  { %v464_v27 = vxor.u32 2147483648, %v204_v21  ;;  %v396_v50 = vmul.u32 2146121005, %v394_v48 }
  0x2f   :  { %367 = vmatpush.bf16.msra.mxu2 %v543_v57  ;;  %v463_v29 = vxor.u32 2147483648, %v203_v22  ;;  %v465_v30 = vxor.u32 2147483648, %v205_v23  ;;  %vm208_vm1 = vcmp.lt.s32.totalorder %v462_v26, 0  ;;  %v397_v55 = vmul.u32 2146121005, %v395_v53 }
  0x30   :  { %381 = vmatpush.bf16.msra.mxu3 %v551_v58  ;;  %vm214_vm2 = vcmp.lt.s32.totalorder %v464_v27, 0  ;;  %v398_v52 = vshrl.u32 %v396_v50, 15 }
  0x31   :  { %vm211_vm3 = vcmp.lt.s32.totalorder %v463_v29, 0  ;;  %vm217_vm4 = vcmp.lt.s32.totalorder %v465_v30, 0  ;;  %vm530_vm5 = vmpackc.low %vm214_vm2, %vm208_vm1  ;;  %v399_v57 = vshrl.u32 %v397_v55, 15 }
  0x32   :  { %vm533_vm6 = vmpackc.low %vm217_vm4, %vm211_vm3  ;;  %v400_v54 = vxor.u32 %v398_v52, %v396_v50 }
  0x33   :  { %v401_v59 = vxor.u32 %v399_v57, %v397_v55 }
  0x34   :  { %v402_v56 = vmul.u32 2221713035, %v400_v54 }
  0x35   :  { %v403_v35 = vmul.u32 2221713035, %v401_v59 }
  0x36   :  { %v404_v58 = vshrl.u32 %v402_v56, 16 }
  0x37   :  { %v405_v1 = vshrl.u32 %v403_v35, 16 }
  0x38   :  { %v406_v61 = vxor.u32 %v404_v58, %v402_v56 }
  0x39   :  { %v407_v4 = vxor.u32 %v405_v1, %v403_v35 }
  0x3a   :  { %v536_v36 = vxor.u32 2147483648, %v406_v61 }
  0x3b   :  { %v537_v10 = vxor.u32 2147483648, %v407_v4 }
  0x3c   :  { %vm410_vm7 = vcmp.lt.s32.totalorder %v536_v36, 0 }
  0x3d   :  { %vm413_vm8 = vcmp.lt.s32.totalorder %v537_v10, 0 }
  0x96   :  { %v125_v14 = vpop.f32.mrf.mxu0 }
  0x97   :  { %v139_v18 = vpop.f32.mrf.mxu1  ;;  %v126_v24 = vadd.f32 %v125_v14, %v83_v17 }
  0x98   :  { %v140_v25 = vadd.f32 %v139_v18, %v84_v19 }
  0x99   :  { %v144_v31 = vmax.f32 %v126_v24, 0.0 }
  0x9a   :  { %v145_v34 = vmax.f32 %v140_v25, 0.0 }
  0x9b   :  { %v218_v40 = vmul.f32 2.0, %v144_v31 }
  0x9c   :  { %v219_v42 = vmul.f32 2.0, %v145_v34 }
  0x9e   :  { %v127_v28 = vpop.f32.mrf.mxu0 }
  0x9f   :  { %v128_v32 = vadd.f32 %v127_v28, %v83_v17  ;;  %v141_v33 = vpop.f32.mrf.mxu1 }
  0xa0   :  { %v142_v37 = vadd.f32 %v141_v33, %v84_v19 }
  0xa1   :  { %v146_v38 = vmax.f32 %v128_v32, 0.0 }
  0xa2   :  { %v147_v39 = vmax.f32 %v142_v37, 0.0 }
  0xa3   :  { %v220_v41 = vmul.f32 2.0, %v146_v38 }
  0xa4   :  { %v221_v43 = vmul.f32 2.0, %v147_v39 }
  0xa5   :  { %v531_v44 = vpack.c.bf16 %v220_v41, %v218_v40 }
  0xa6   :  { %v534_v45 = vpack.c.bf16 %v221_v43, %v219_v42 }
  0xa7   :  { %532 = vmatmul.msk.bf16.vlgmr.msra.gmra.mxu2 %vm530_vm5, %v531_v44 }
  0xa8   :  { %535 = vmatmul.msk.bf16.vlgmr.msra.gmra.mxu3 %vm533_vm6, %v534_v45 }
 0x12a   :  { %v369_v62 = vpop.f32.mrf.mxu2 }
 0x12b   :  { %v370_v63 = vadd.f32 %v567_v60, %v369_v62  ;;  %v383_v0 = vpop.f32.mrf.mxu3 }
 0x12d   :  { %v384_v2 = vadd.f32 %v383_v0, %v370_v63 }
 0x12f   :  { %v388_v3 = vmax.f32 %v384_v2, 0.0 }
 0x131   :  { %v414_v5 = vmul.f32 2.0, %v388_v3 }
 0x132   :  { %v371_v6 = vpop.f32.mrf.mxu2 }
 0x133   :  { %v416_v7 = vsel %vm410_vm7, %v414_v5, 0.0  ;;  %v372_v8 = vadd.f32 %v567_v60, %v371_v6  ;;  %v385_v9 = vpop.f32.mrf.mxu3 }
 0x134   :  { %418 = vst [vmem:[#allocation9] sm:$0xff] %v416_v7 }
 0x135   :  { %v386_v11 = vadd.f32 %v385_v9, %v372_v8 }
 0x137   :  { %v389_v12 = vmax.f32 %v386_v11, 0.0 }
 0x139   :  { %v415_v13 = vmul.f32 2.0, %v389_v12 }
 0x13b   :  { %v417_v14 = vsel %vm413_vm8, %v415_v13, 0.0 }
 0x13c   :  { %419 = vst [vmem:[#allocation9 + $0x8] sm:$0xff] %v417_v14 }
 0x13d   :  { %432 = dma.vmem_to_hbm [thread:$0]  %s425_s17, 256, %s427_s20, [#allocation5], %s671_s29, %s671_s29, %s672_s30  }
 0x13e   :  { %668 = dma.done.wait [#allocation5], 256  }
 0x13f   :  { %669 = vsyncadd [#allocation5], 4294967040 }
 0x140   :  { %437 = vsyncpa [#allocation4], 1 }
 0x141   :  { %438 = vsyncpa [#allocation7], 1 }
 0x142   :  { %439 = vsyncpa [#allocation5], 1 }

</bundles_post_ra>
